<compile_context>
chip_gen: v5e
topology: v5e:2x2
jax: 0.10.0
libtpu: 0.0.40
codegen_flags: <defaults>
</compile_context>

<pallas_src>
import functools

import jax
import jax.numpy as jnp
from jax import lax
from jax.experimental import pallas as pl
from jax.experimental.pallas import tpu as pltpu


def _pointnet_kernel(x_ref, w1_ref, b1_ref, w2_ref, b2_ref, w3_ref, b3_ref,
                     o_ref, acc_ref, *, n_points, tiles_per_split, needs_mask):
    # x_ref : (1, 3, tn)    point tile (points on lanes) for one batch element
    # w1_ref: (3, C1, 1)    layer-1 weight, one (C1,1) column per input channel (f32)
    # w2_ref: (C2, C1)      layer-2 weight (bf16 MXU operand by default)
    # w3_ref: (C3, C2)      layer-3 weight (bf16 MXU operand by default)
    # bK_ref: (CK, 1)       folded conv+BN bias (f32)
    # o_ref : (1, 1, C3, 1) per-(split, batch) global max, written on the last tile
    # acc_ref: (C3, 128)    lane-dense running max (VMEM scratch, resident across tiles)
    n_tile = pl.program_id(2)
    tn = x_ref.shape[-1]

    x = x_ref[0]                                          # (3, tn) f32

    # Layer 1: C_in == 3 -> three VPU broadcast-FMAs.  A K=3 MXU matmul would
    # use ~1-2% of the contraction depth and still pay full issue/drain cost,
    # so keep the MXU pipeline for layers 2/3.
    h = (w1_ref[0] * x[0:1, :]
         + w1_ref[1] * x[1:2, :]
         + w1_ref[2] * x[2:3, :])                         # (C1, tn) f32
    h = jnp.maximum(h + b1_ref[...], 0.0)

    # Layers 2/3: channels-major MXU matmuls (M=C_out, K=C_in, N=tn points).
    # bf16 operands by default (MXU fast path on all generations); accumulation,
    # bias-add, ReLU and the max all stay in f32.
    h = jnp.dot(w2_ref[...], h.astype(w2_ref.dtype),
                preferred_element_type=jnp.float32)       # (C2, tn) f32
    h = jnp.maximum(h + b2_ref[...], 0.0)
    h = jnp.dot(w3_ref[...], h.astype(w3_ref.dtype),
                preferred_element_type=jnp.float32)       # (C3, tn) f32
    h = jnp.maximum(h + b3_ref[...], 0.0)                 # >= 0

    if needs_mask:
        # Lanes past the true point count hold undefined DMA padding (or a
        # re-read block for a split's out-of-range tiles).  Zero them before
        # the max: 0 is the identity for the max of post-ReLU activations.
        # Per-lane arithmetic never mixes lanes, so garbage stays in its lane.
        s = pl.program_id(0)
        logical_tile = s * tiles_per_split + n_tile
        lane = lax.broadcasted_iota(jnp.int32, (1, tn), 1)
        valid = (logical_tile * tn + lane) < n_points
        h = jnp.where(valid, h, 0.0)

    # Lane-group fold: pure VPU maxima down to a lane-dense (C3, 128) partial
    # max (static, lane-aligned slices -> no relayout, no per-tile XLU reduce).
    tile_m = h[:, 0:128]
    for i in range(1, tn // 128):
        tile_m = jnp.maximum(tile_m, h[:, i * 128:(i + 1) * 128])

    @pl.when(n_tile == 0)
    def _():
        # Post-ReLU activations are >= 0, so 0 is the identity for the max
        # (no -inf special value needed).  Must become -inf if the final ReLU
        # is ever removed.
        acc_ref[...] = jnp.zeros_like(acc_ref)

    acc_ref[...] = jnp.maximum(acc_ref[...], tile_m)

    @pl.when(n_tile == tiles_per_split - 1)
    def _():
        # Single 128->1 cross-lane reduce + narrow write, once per (split, batch).
        o_ref[...] = jnp.max(acc_ref[...], axis=1, keepdims=True)[None, None]


def _prep_params(folded_params, mxu_dtype):
    """folded params: [(W (O,I), b (O,))] x3 -> kernel-layout operands."""
    (w1, b1), (w2, b2), (w3, b3) = folded_params
    w1_k = jnp.transpose(w1)[:, :, None].astype(jnp.float32)   # (3, C1, 1), VPU layer
    return (w1_k, b1.reshape(-1, 1).astype(jnp.float32),
            w2.astype(mxu_dtype), b2.reshape(-1, 1).astype(jnp.float32),
            w3.astype(mxu_dtype), b3.reshape(-1, 1).astype(jnp.float32))


@functools.partial(jax.jit, static_argnames=("tn", "mxu_dtype"))
def pointnet_forward(x_bcn, folded_params, *, tn=8192, mxu_dtype=jnp.bfloat16):
    """x_bcn: (B, 3, N) float32 (native PyTorch NCL layout).  Returns (B, C3)."""
    B, c_in, N = x_bcn.shape
    assert c_in == 3
    w1, b1, w2, b2, w3, b3 = _prep_params(folded_params, mxu_dtype)
    c3 = w3.shape[0]

    # Point-tile size: multiple of 128 lanes, capped at the lane-padded cloud
    # size so small clouds use a single tile.  The large default (8192)
    # amortizes per-step overhead and per-tile MXU weight pushes; its f32
    # intermediates are ~12-16 MiB of VMEM, covered by the explicit limit below.
    n_pad128 = ((N + 127) // 128) * 128
    tn = max(128, min((tn // 128) * 128, n_pad128))
    n_tiles = -(-N // tn)

    # v7x: with a single cloud only one TensorCore would get work on the
    # "parallel" batch axis, so split the point tiles across a leading parallel
    # axis and fold the per-split partial maxima in the wrapper.  No-op elsewhere.
    n_splits = 2 if (B == 1 and n_tiles >= 2) else 1
    tiles_per_split = -(-n_tiles // n_splits)
    needs_mask = (n_splits * tiles_per_split * tn) != N

    kernel = functools.partial(
        _pointnet_kernel, n_points=N, tiles_per_split=tiles_per_split,
        needs_mask=needs_mask)

    last_block = n_tiles - 1

    def x_index_map(s, b, n):
        # Clamp so a split's trailing (fully out-of-range) tiles re-read a valid
        # block; the kernel masks their lanes to 0 via the logical tile index.
        return (b, 0, jnp.minimum(s * tiles_per_split + n, last_block))

    def const_spec(shape):
        zeros = (0,) * len(shape)
        return pl.BlockSpec(shape, lambda s, b, n: zeros)

    out = pl.pallas_call(
        kernel,
        out_shape=jax.ShapeDtypeStruct((n_splits, B, c3, 1), jnp.float32),
        grid_spec=pltpu.PrefetchScalarGridSpec(
            num_scalar_prefetch=0,
            grid=(n_splits, B, tiles_per_split),
            in_specs=[
                pl.BlockSpec((1, 3, tn), x_index_map),
                const_spec(w1.shape), const_spec(b1.shape),
                const_spec(w2.shape), const_spec(b2.shape),
                const_spec(w3.shape), const_spec(b3.shape),
            ],
            out_specs=pl.BlockSpec((1, 1, c3, 1), lambda s, b, n: (s, b, 0, 0)),
            scratch_shapes=[pltpu.VMEM((c3, 128), jnp.float32)],
        ),
        compiler_params=pltpu.CompilerParams(
            # Split/batch axes "parallel" (v7x megacore gets both TCs busy even
            # at B == 1); the point-tile axis is the running-max reduction ->
            # "arbitrary".
            dimension_semantics=("parallel", "parallel", "arbitrary"),
            # Explicit scoped-VMEM budget: ~12-16 MiB live at tn=8192.  48 MiB
            # is comfortably under physical VMEM on v5e/v6e (128 MiB) and v7x
            # (64 MiB) while clearing every generation's scoped default.
            vmem_limit_bytes=48 * 1024 * 1024),
    )(x_bcn, w1, b1, w2, b2, w3, b3)

    # Fold the split partial maxima (post-ReLU >= 0, unused splits emit zeros);
    # AdaptiveMaxPool1d(1) + squeeze(-1) like the PyTorch module -> (B, C3).
    return jnp.max(out[..., 0], axis=0)


def make_params(key, out_channels=(32, 64, 128), eps=1e-5):
    """Deterministic Conv1d(k=1) + BatchNorm1d(eval) params, BN folded into conv."""
    in_c = 3
    folded, raw = [], []
    for oc in out_channels:
        key, kw, kb, kg, kbe, km, kv = jax.random.split(key, 7)
        W = jax.random.normal(kw, (oc, in_c), jnp.float32) * 0.1      # conv weight (O, I)
        b = jax.random.normal(kb, (oc,), jnp.float32) * 0.1           # conv bias
        gamma = 1.0 + 0.1 * jax.random.normal(kg, (oc,), jnp.float32)
        beta = 0.1 * jax.random.normal(kbe, (oc,), jnp.float32)
        mean = 0.1 * jax.random.normal(km, (oc,), jnp.float32)
        var = jnp.abs(jax.random.normal(kv, (oc,), jnp.float32)) + 0.5
        raw.append((W, b, gamma, beta, mean, var))

        scale = gamma / jnp.sqrt(var + eps)
        W_eff = W * scale[:, None]                   # (O, I)
        b_eff = (b - mean) * scale + beta            # (O,)
        folded.append((W_eff, b_eff))
        in_c = oc
    return folded, raw


def reference_forward(x_bcn, raw_params, eps=1e-5):
    """Plain-JAX reference mirroring the PyTorch forward (eval-mode BN). x: (B, 3, N)."""
    x = x_bcn
    for (W, b, gamma, beta, mean, var) in raw_params:
        x = jnp.einsum("oc,bcn->bon", W, x) + b[None, :, None]
        x = (x - mean[None, :, None]) / jnp.sqrt(var[None, :, None] + eps)
        x = x * gamma[None, :, None] + beta[None, :, None]
        x = jnp.maximum(x, 0.0)
    return jnp.max(x, axis=-1)  # AdaptiveMaxPool1d(1) + squeeze(-1) -> (B, C)


if __name__ == "__main__":
    key = jax.random.PRNGKey(0)
    key, kx = jax.random.split(key)

    B, N = 2, 200  # PyTorch input layout (B, 3, N); N deliberately not tile-aligned
    x_bcn = jax.random.normal(kx, (B, 3, N), jnp.float32)

    folded_params, raw_params = make_params(key)
    ref = reference_forward(x_bcn, raw_params)

    # 1) defaults: bf16 MXU operands, single lane-padded point tile, in-kernel
    #    tail masking (no jnp.pad copy).
    out = jax.block_until_ready(pointnet_forward(x_bcn, folded_params))
    assert out.shape == (B, 128), out.shape
    assert jnp.allclose(out, ref, atol=5e-2, rtol=5e-2), (
        float(jnp.max(jnp.abs(out - ref))))

    # 2) f32 MXU operands.  Typically ~1e-6 off the reference; tolerance kept
    #    modest in case a generation emulates f32 matmul via reduced-precision
    #    passes.
    out_f32 = jax.block_until_ready(
        pointnet_forward(x_bcn, folded_params, mxu_dtype=jnp.float32))
    assert jnp.allclose(out_f32, ref, atol=1e-2, rtol=1e-2), (
        float(jnp.max(jnp.abs(out_f32 - ref))))

    # 3) small tile -> multi-tile running-max reduction + partial last block.
    #    Tiling must not change per-point math, so it matches the default run
    #    (same bf16 operands) essentially bit-exactly.
    out_tiled = jax.block_until_ready(
        pointnet_forward(x_bcn, folded_params, tn=128))
    assert jnp.allclose(out_tiled, out, atol=1e-5, rtol=1e-5), (
        float(jnp.max(jnp.abs(out_tiled - out))))
    assert jnp.allclose(out_tiled, ref, atol=5e-2, rtol=5e-2), (
        float(jnp.max(jnp.abs(out_tiled - ref))))

    # 4) B == 1 -> point tiles split across the leading "parallel" axis (v7x
    #    dual-TC path).  Must match both the unsplit single-tile run and the
    #    reference.
    key, kx1 = jax.random.split(key)
    x1 = jax.random.normal(kx1, (1, 3, 500), jnp.float32)
    ref1 = reference_forward(x1, raw_params)
    out1_split = jax.block_until_ready(
        pointnet_forward(x1, folded_params, tn=128))     # 4 tiles -> 2 splits
    out1_single = jax.block_until_ready(
        pointnet_forward(x1, folded_params))             # 1 tile  -> no split
    assert out1_split.shape == (1, 128), out1_split.shape
    assert jnp.allclose(out1_split, out1_single, atol=1e-5, rtol=1e-5), (
        float(jnp.max(jnp.abs(out1_split - out1_single))))
    assert jnp.allclose(out1_split, ref1, atol=5e-2, rtol=5e-2), (
        float(jnp.max(jnp.abs(out1_split - ref1))))

    print("KERNEL_OK")
</pallas_src>

<mosaic_0001>
module attributes {stable_mosaic.version = 11 : i64} {
  func.func @_pointnet_kernel(%arg0: i32, %arg1: i32, %arg2: i32, %arg3: memref<1x3x256xf32, #tpu.memory_space<vmem>>, %arg4: memref<3x32x1xf32, #tpu.memory_space<vmem>>, %arg5: memref<32x1xf32, #tpu.memory_space<vmem>>, %arg6: memref<64x32xbf16, #tpu.memory_space<vmem>>, %arg7: memref<64x1xf32, #tpu.memory_space<vmem>>, %arg8: memref<128x64xbf16, #tpu.memory_space<vmem>>, %arg9: memref<128x1xf32, #tpu.memory_space<vmem>>, %arg10: memref<1x1x128x1xf32, #tpu.memory_space<vmem>>, %arg11: memref<128x128xf32, #tpu.memory_space<vmem>>) attributes {dimension_semantics = [#tpu.dimension_semantics<parallel>, #tpu.dimension_semantics<parallel>, #tpu.dimension_semantics<arbitrary>], iteration_bounds = array<i64: 1, 2, 1>, scalar_prefetch = 0 : i64, scratch_operands = 1 : i64, tpu.core_type = #tpu.core_type<tc>, window_params = [{transform_indices = @transform_0, window_bounds = array<i64: 1, 3, 256>}, {pipeline_mode = #tpu.pipeline_mode<synchronous>, transform_indices = @transform_1, window_bounds = array<i64: 3, 32, 1>}, {pipeline_mode = #tpu.pipeline_mode<synchronous>, transform_indices = @transform_2, window_bounds = array<i64: 32, 1>}, {pipeline_mode = #tpu.pipeline_mode<synchronous>, transform_indices = @transform_3, window_bounds = array<i64: 64, 32>}, {pipeline_mode = #tpu.pipeline_mode<synchronous>, transform_indices = @transform_4, window_bounds = array<i64: 64, 1>}, {pipeline_mode = #tpu.pipeline_mode<synchronous>, transform_indices = @transform_5, window_bounds = array<i64: 128, 64>}, {pipeline_mode = #tpu.pipeline_mode<synchronous>, transform_indices = @transform_6, window_bounds = array<i64: 128, 1>}, {transform_indices = @transform_7, window_bounds = array<i64: 1, 1, 128, 1>}]} {
    %c0 = arith.constant 0 : index
    %c0_0 = arith.constant 0 : index
    %c0_1 = arith.constant 0 : index
    %0 = vector.load %arg3[%c0, %c0_0, %c0_1] : memref<1x3x256xf32, #tpu.memory_space<vmem>>, vector<1x3x256xf32>
    %1 = vector.shape_cast %0 : vector<1x3x256xf32> to vector<3x256xf32>
    %c0_2 = arith.constant 0 : index
    %c0_3 = arith.constant 0 : index
    %c0_4 = arith.constant 0 : index
    %2 = vector.load %arg4[%c0_2, %c0_3, %c0_4] : memref<3x32x1xf32, #tpu.memory_space<vmem>>, vector<1x32x1xf32>
    %3 = vector.shape_cast %2 : vector<1x32x1xf32> to vector<32x1xf32>
    %4 = vector.extract_strided_slice %1 {offsets = [0, 0], sizes = [1, 256], strides = [1, 1]} : vector<3x256xf32> to vector<1x256xf32>
    %5 = vector.broadcast %3 : vector<32x1xf32> to vector<32x256xf32>
    %6 = vector.broadcast %4 : vector<1x256xf32> to vector<32x256xf32>
    %7 = arith.mulf %5, %6 : vector<32x256xf32>
    %c1 = arith.constant 1 : index
    %c0_5 = arith.constant 0 : index
    %c0_6 = arith.constant 0 : index
    %8 = vector.load %arg4[%c1, %c0_5, %c0_6] : memref<3x32x1xf32, #tpu.memory_space<vmem>>, vector<1x32x1xf32>
    %9 = vector.shape_cast %8 : vector<1x32x1xf32> to vector<32x1xf32>
    %10 = vector.extract_strided_slice %1 {offsets = [1, 0], sizes = [1, 256], strides = [1, 1]} : vector<3x256xf32> to vector<1x256xf32>
    %11 = vector.broadcast %9 : vector<32x1xf32> to vector<32x256xf32>
    %12 = vector.broadcast %10 : vector<1x256xf32> to vector<32x256xf32>
    %13 = arith.mulf %11, %12 : vector<32x256xf32>
    %14 = arith.addf %7, %13 : vector<32x256xf32>
    %c2 = arith.constant 2 : index
    %c0_7 = arith.constant 0 : index
    %c0_8 = arith.constant 0 : index
    %15 = vector.load %arg4[%c2, %c0_7, %c0_8] : memref<3x32x1xf32, #tpu.memory_space<vmem>>, vector<1x32x1xf32>
    %16 = vector.shape_cast %15 : vector<1x32x1xf32> to vector<32x1xf32>
    %17 = vector.extract_strided_slice %1 {offsets = [2, 0], sizes = [1, 256], strides = [1, 1]} : vector<3x256xf32> to vector<1x256xf32>
    %18 = vector.broadcast %16 : vector<32x1xf32> to vector<32x256xf32>
    %19 = vector.broadcast %17 : vector<1x256xf32> to vector<32x256xf32>
    %20 = arith.mulf %18, %19 : vector<32x256xf32>
    %21 = arith.addf %14, %20 : vector<32x256xf32>
    %c0_9 = arith.constant 0 : index
    %c0_10 = arith.constant 0 : index
    %22 = vector.load %arg5[%c0_9, %c0_10] : memref<32x1xf32, #tpu.memory_space<vmem>>, vector<32x1xf32>
    %23 = vector.broadcast %22 : vector<32x1xf32> to vector<32x256xf32>
    %24 = arith.addf %21, %23 : vector<32x256xf32>
    %cst = arith.constant 0.000000e+00 : f32
    %25 = vector.broadcast %cst : f32 to vector<32x256xf32>
    %26 = arith.maximumf %24, %25 : vector<32x256xf32>
    %c0_11 = arith.constant 0 : index
    %c0_12 = arith.constant 0 : index
    %27 = vector.load %arg6[%c0_11, %c0_12] : memref<64x32xbf16, #tpu.memory_space<vmem>>, vector<64x32xbf16>
    %28 = arith.truncf %26 : vector<32x256xf32> to vector<32x256xbf16>
    %cst_13 = arith.constant dense<0.000000e+00> : vector<64x256xf32>
    %29 = tpu.matmul %27, %28, %cst_13 {dimension_numbers = #tpu.dot_dimension_numbers<[1], [0], [0], [1], [0, 0, 1, 1], [], []>} : vector<64x32xbf16>, vector<32x256xbf16>, vector<64x256xf32> -> vector<64x256xf32>
    %c0_14 = arith.constant 0 : index
    %c0_15 = arith.constant 0 : index
    %30 = vector.load %arg7[%c0_14, %c0_15] : memref<64x1xf32, #tpu.memory_space<vmem>>, vector<64x1xf32>
    %31 = vector.broadcast %30 : vector<64x1xf32> to vector<64x256xf32>
    %32 = arith.addf %29, %31 : vector<64x256xf32>
    %cst_16 = arith.constant 0.000000e+00 : f32
    %33 = vector.broadcast %cst_16 : f32 to vector<64x256xf32>
    %34 = arith.maximumf %32, %33 : vector<64x256xf32>
    %c0_17 = arith.constant 0 : index
    %c0_18 = arith.constant 0 : index
    %35 = vector.load %arg8[%c0_17, %c0_18] : memref<128x64xbf16, #tpu.memory_space<vmem>>, vector<128x64xbf16>
    %36 = arith.truncf %34 : vector<64x256xf32> to vector<64x256xbf16>
    %cst_19 = arith.constant dense<0.000000e+00> : vector<128x256xf32>
    %37 = tpu.matmul %35, %36, %cst_19 {dimension_numbers = #tpu.dot_dimension_numbers<[1], [0], [0], [1], [0, 0, 1, 1], [], []>} : vector<128x64xbf16>, vector<64x256xbf16>, vector<128x256xf32> -> vector<128x256xf32>
    %c0_20 = arith.constant 0 : index
    %c0_21 = arith.constant 0 : index
    %38 = vector.load %arg9[%c0_20, %c0_21] : memref<128x1xf32, #tpu.memory_space<vmem>>, vector<128x1xf32>
    %39 = vector.broadcast %38 : vector<128x1xf32> to vector<128x256xf32>
    %40 = arith.addf %37, %39 : vector<128x256xf32>
    %cst_22 = arith.constant 0.000000e+00 : f32
    %41 = vector.broadcast %cst_22 : f32 to vector<128x256xf32>
    %42 = arith.maximumf %40, %41 : vector<128x256xf32>
    %c1_i32 = arith.constant 1 : i32
    %43 = arith.muli %arg0, %c1_i32 : i32
    %44 = arith.addi %43, %arg2 : i32
    %45 = tpu.iota {dimensions = array<i32: 1>} : vector<1x256xi32>
    %c256_i32 = arith.constant 256 : i32
    %46 = arith.muli %44, %c256_i32 : i32
    %47 = vector.broadcast %46 : i32 to vector<1x256xi32>
    %48 = arith.addi %47, %45 : vector<1x256xi32>
    %c200_i32 = arith.constant 200 : i32
    %49 = vector.broadcast %c200_i32 : i32 to vector<1x256xi32>
    %50 = arith.cmpi slt, %48, %49 : vector<1x256xi32>
    %cst_23 = arith.constant 0.000000e+00 : f32
    %51 = vector.shape_cast %50 : vector<1x256xi1> to vector<1x256xi1>
    %52 = vector.broadcast %51 : vector<1x256xi1> to vector<128x256xi1>
    %53 = vector.broadcast %cst_23 : f32 to vector<128x256xf32>
    %54 = arith.select %52, %42, %53 : vector<128x256xi1>, vector<128x256xf32>
    %55 = vector.extract_strided_slice %54 {offsets = [0, 0], sizes = [128, 128], strides = [1, 1]} : vector<128x256xf32> to vector<128x128xf32>
    %56 = vector.extract_strided_slice %54 {offsets = [0, 128], sizes = [128, 128], strides = [1, 1]} : vector<128x256xf32> to vector<128x128xf32>
    %57 = arith.maximumf %55, %56 : vector<128x128xf32>
    %c0_i32 = arith.constant 0 : i32
    %58 = arith.cmpi eq, %arg2, %c0_i32 : i32
    %59 = arith.extui %58 : i1 to i32
    %c0_i32_24 = arith.constant 0 : i32
    %60 = arith.cmpi ne, %59, %c0_i32_24 : i32
    scf.if %60 {
      %cst_31 = arith.constant 0.000000e+00 : f32
      %67 = vector.broadcast %cst_31 : f32 to vector<128x128xf32>
      %c0_32 = arith.constant 0 : index
      %c0_33 = arith.constant 0 : index
      %68 = vector.load %arg11[%c0_32, %c0_33] : memref<128x128xf32, #tpu.memory_space<vmem>>, vector<128x128xf32>
      tpu.vector_store %arg11[%c0_32, %c0_33], %67 {strides = array<i32>} : memref<128x128xf32, #tpu.memory_space<vmem>>, vector<128x128xf32>,
    } else {
    }
    %c0_25 = arith.constant 0 : index
    %c0_26 = arith.constant 0 : index
    %61 = vector.load %arg11[%c0_25, %c0_26] : memref<128x128xf32, #tpu.memory_space<vmem>>, vector<128x128xf32>
    %62 = arith.maximumf %61, %57 : vector<128x128xf32>
    %c0_27 = arith.constant 0 : index
    %c0_28 = arith.constant 0 : index
    %63 = vector.load %arg11[%c0_27, %c0_28] : memref<128x128xf32, #tpu.memory_space<vmem>>, vector<128x128xf32>
    tpu.vector_store %arg11[%c0_27, %c0_28], %62 {strides = array<i32>} : memref<128x128xf32, #tpu.memory_space<vmem>>, vector<128x128xf32>,
    %c0_i32_29 = arith.constant 0 : i32
    %64 = arith.cmpi eq, %arg2, %c0_i32_29 : i32
    %65 = arith.extui %64 : i1 to i32
    %c0_i32_30 = arith.constant 0 : i32
    %66 = arith.cmpi ne, %65, %c0_i32_30 : i32
    scf.if %66 {
      %c0_31 = arith.constant 0 : index
      %c0_32 = arith.constant 0 : index
      %67 = vector.load %arg11[%c0_31, %c0_32] : memref<128x128xf32, #tpu.memory_space<vmem>>, vector<128x128xf32>
      %cst_33 = arith.constant dense<0xFF800000> : vector<128xf32>
      %68 = vector.multi_reduction <maximumf>, %67, %cst_33 [1] : vector<128x128xf32> to vector<128xf32>
      %69 = vector.shape_cast %68 : vector<128xf32> to vector<128x1xf32>
      %70 = vector.shape_cast %69 : vector<128x1xf32> to vector<1x1x128x1xf32>
      %c0_34 = arith.constant 0 : index
      %c0_35 = arith.constant 0 : index
      %c0_36 = arith.constant 0 : index
      %c0_37 = arith.constant 0 : index
      %71 = vector.load %arg10[%c0_34, %c0_35, %c0_36, %c0_37] : memref<1x1x128x1xf32, #tpu.memory_space<vmem>>, vector<1x1x128x1xf32>
      tpu.vector_store %arg10[%c0_34, %c0_35, %c0_36, %c0_37], %70 {strides = array<i32>} : memref<1x1x128x1xf32, #tpu.memory_space<vmem>>, vector<1x1x128x1xf32>,
    } else {
    }
    return
  }
  func.func @transform_0(%arg0: i32, %arg1: i32, %arg2: i32) -> (i32, i32, i32) {
    %c1_i32 = arith.constant 1 : i32
    %0 = arith.muli %arg0, %c1_i32 : i32
    %1 = arith.addi %0, %arg2 : i32
    %c0_i32 = arith.constant 0 : i32
    %2 = arith.minsi %1, %c0_i32 : i32
    %c0_i32_0 = arith.constant 0 : i32
    %c0_i32_1 = arith.constant 0 : i32
    return %arg1, %c0_i32_0, %2 : i32, i32, i32
  }
  func.func @transform_1(%arg0: i32, %arg1: i32, %arg2: i32) -> (i32, i32, i32) {
    %c0_i32 = arith.constant 0 : i32
    %c0_i32_0 = arith.constant 0 : i32
    %c0_i32_1 = arith.constant 0 : i32
    %c0_i32_2 = arith.constant 0 : i32
    return %c0_i32, %c0_i32_0, %c0_i32_1 : i32, i32, i32
  }
  func.func @transform_2(%arg0: i32, %arg1: i32, %arg2: i32) -> (i32, i32) {
    %c0_i32 = arith.constant 0 : i32
    %c0_i32_0 = arith.constant 0 : i32
    %c0_i32_1 = arith.constant 0 : i32
    return %c0_i32, %c0_i32_0 : i32, i32
  }
  func.func @transform_3(%arg0: i32, %arg1: i32, %arg2: i32) -> (i32, i32) {
    %c0_i32 = arith.constant 0 : i32
    %c0_i32_0 = arith.constant 0 : i32
    %c0_i32_1 = arith.constant 0 : i32
    return %c0_i32, %c0_i32_0 : i32, i32
  }
  func.func @transform_4(%arg0: i32, %arg1: i32, %arg2: i32) -> (i32, i32) {
    %c0_i32 = arith.constant 0 : i32
    %c0_i32_0 = arith.constant 0 : i32
    %c0_i32_1 = arith.constant 0 : i32
    return %c0_i32, %c0_i32_0 : i32, i32
  }
  func.func @transform_5(%arg0: i32, %arg1: i32, %arg2: i32) -> (i32, i32) {
    %c0_i32 = arith.constant 0 : i32
    %c0_i32_0 = arith.constant 0 : i32
    %c0_i32_1 = arith.constant 0 : i32
    return %c0_i32, %c0_i32_0 : i32, i32
  }
  func.func @transform_6(%arg0: i32, %arg1: i32, %arg2: i32) -> (i32, i32) {
    %c0_i32 = arith.constant 0 : i32
    %c0_i32_0 = arith.constant 0 : i32
    %c0_i32_1 = arith.constant 0 : i32
    return %c0_i32, %c0_i32_0 : i32, i32
  }
  func.func @transform_7(%arg0: i32, %arg1: i32, %arg2: i32) -> (i32, i32, i32, i32) {
    %c0_i32 = arith.constant 0 : i32
    %c0_i32_0 = arith.constant 0 : i32
    %c0_i32_1 = arith.constant 0 : i32
    return %arg0, %arg1, %c0_i32, %c0_i32_0 : i32, i32, i32, i32
  }
}

</mosaic_0001>

<bundles_post_ra>
// kernel: pointnet_forward.1
= control target key start
LH: loop header
LB: loop body
LE: loop exit
PB: predicated region body
PF: predicated region fallthrough
CT: control target
= control target key end

     0   :  { %s1498_s24 = smov 0   ;;  %s1500_s25 = smov 0   ;;  %s1780_s0 = inlined_call_operand.vmem [shape: f32[2,3,200], index: 0, kind: input, shape index: {}]   ;;  %s1781_s1 = inlined_call_operand.vmem [shape: f32[3,32,1], index: 1, kind: input, shape index: {}]   ;;  %s1782_s2 = inlined_call_operand.vmem [shape: f32[32,1], index: 2, kind: input, shape index: {}]   ;;  %s1783_s3 = inlined_call_operand.vmem [shape: bf16[64,32], index: 3, kind: input, shape index: {}]   ;;  %s1784_s4 = inlined_call_operand.vmem [shape: f32[64,1], index: 4, kind: input, shape index: {}]   ;;  %s1785_s5 = inlined_call_operand.vmem [shape: bf16[128,64], index: 5, kind: input, shape index: {}]   ;;  %s1786_s6 = inlined_call_operand.vmem [shape: f32[128,1], index: 6, kind: input, shape index: {}]   ;;  %s1787_s7 = inlined_call_operand.vmem [shape: f32[1,2,128,1], index: 7, kind: output, shape index: {}]  }
   0x1   :  { %s1502_s26 = smov 0  }
   0x2 LB: > { %s32_s27 = sadd.s32 1, %s1451_s25  ;;  %p1296_p0 = scmp.ge.s32.totalorder %s1455_s26, 1  ;;  %s1455_s26 = sphi %s1502_s26, %s17_s26   ;;  %s1451_s25 = sphi %s1500_s25, %s1789_s25   ;;  %s1447_s24 = sphi %s1498_s24, %s1788_s24  }
   0x3   : > { %p34_p1 = scmp.ge.s32.totalorder %s32_s27, 2  ;;  %p277_p2 = scmp.lt.s32.totalorder %s1455_s26, 3 }
   0x5   : > { %s1791_s27 = smov (%p34_p1, %s32_s27), 0  ;;  %p278_p3 = pnand %p1296_p0, %p277_p2 }
   0x6   : > { %p324_p4 = scmp.lt.s32.totalorder (!%p278_p3), %s1447_s24, 1 }
   0x7   : > { %281 = sbr.rel (%p278_p3) target bundleno = 729 (0x2d9), region = 48 }
   0xc   : > { %v1307_v0 = vld [vmem:[%s1781_s1 + $0x50] sm:$0xff]  ;;  %v1457_v3 = vmov 0   ;;  %v1308_v4 = vld [vmem:[%s1781_s1 + $0x58] sm:$0xff]  ;;  %v1301_v7 = vld [vmem:[%s1781_s1 + $0x20] sm:$0xff]  ;;  %s1793_s24 = smov (!%p324_p4, %s1447_s24), 1  ;;  %vm600_vm0 = vcmask 261120  }
   0xd   : > { %v1303_v1 = vld [vmem:[%s1781_s1 + $0x30] sm:$0xff]  ;;  %1432 = vset.pattern.permute.xlu2 %v1457_v3  ;;  %1431 = vset.pattern.permute.xlu1 %v1457_v3  ;;  %v1304_v5 = vld [vmem:[%s1781_s1 + $0x38] sm:$0xff]  ;;  %v348_v8 = vld [vmem:[%s1781_s1 + $0x8] sm:$0xff]  ;;  %s1383_s9 = sshll.u32 %s1793_s24, 3  ;;  %vm847_vm1 = vcmask 523264   ;;  %s1384_s18 = sshll.u32 %s1793_s24, 7 }
   0xe   : > { %v349_v2 = vld [vmem:[%s1781_s1 + $0x10] sm:$0xff]  ;;  %1430 = vset.pattern.permute.xlu0 %v1457_v3  ;;  %450 = vperm.xlu2 %1432, %v1307_v0   ;;  %v350_v6 = vld [vmem:[%s1781_s1 + $0x18] sm:$0xff]  ;;  %v347_v9 = vld [vmem:[%s1781_s1] sm:$0xff]  ;;  %s331_s12 = scalar_lea.vmem %s1780_s0, %s1383_s9  ;;  %s1737_s21 = scalar_lea.vmem %s1787_s7, %s1384_s18  ;;  %vm1183_vm3 = vcmask 7168  }
   0xf   : > { %403 = vperm.xlu1 %1431, %v1303_v1   ;;  %363 = vperm.xlu0 %1430, %v349_v2   ;;  %v1306_v10 = vld [vmem:[%s1781_s1 + $0x48] sm:$0xff]  ;;  %v1305_v11 = vld [vmem:[%s1781_s1 + $0x40] sm:$0xff]  ;;  %v483_v14 = vld [vmem:[%s1782_s2 + $0x18] sm:$0xff] }
  0x10   : > { %v1302_v12 = vld [vmem:[%s1781_s1 + $0x28] sm:$0xff]  ;;  %v480_v13 = vld [vmem:[%s1782_s2] sm:$0xff]  ;;  %v482_v15 = vld [vmem:[%s1782_s2 + $0x10] sm:$0xff] }
  0x11   : > { %v539_v16 = vld [vmem:[%s1784_s4 + $0x38] sm:$0xff]  ;;  %v538_v17 = vld [vmem:[%s1784_s4 + $0x30] sm:$0xff]  ;;  %v481_v18 = vld [vmem:[%s1782_s2 + $0x8] sm:$0xff] }
  0x12   : > { %v534_v19 = vld [vmem:[%s1784_s4 + $0x10] sm:$0xff]  ;;  %v537_v20 = vld [vmem:[%s1784_s4 + $0x28] sm:$0xff]  ;;  %v536_v21 = vld [vmem:[%s1784_s4 + $0x20] sm:$0xff] }
  0x13   : > { %v533_v22 = vld [vmem:[%s1784_s4 + $0x8] sm:$0xff]  ;;  %v532_v23 = vld [vmem:[%s1784_s4] sm:$0xff]  ;;  %v535_v24 = vld [vmem:[%s1784_s4 + $0x18] sm:$0xff] }
  0x14   : > { %v713_v25 = vld [vmem:[%s1786_s6 + $0x10] sm:$0xff]  ;;  %v712_v26 = vld [vmem:[%s1786_s6 + $0x8] sm:$0xff]  ;;  %v711_v27 = vld [vmem:[%s1786_s6] sm:$0xff] }
  0x15   : > { %v716_v28 = vld [vmem:[%s1786_s6 + $0x28] sm:$0xff]  ;;  %v715_v29 = vld [vmem:[%s1786_s6 + $0x20] sm:$0xff]  ;;  %v714_v30 = vld [vmem:[%s1786_s6 + $0x18] sm:$0xff] }
  0x16   : > { %455 = vperm.xlu2 %1432, %v1308_v4   ;;  %v719_v31 = vld [vmem:[%s1786_s6 + $0x40] sm:$0xff]  ;;  %v718_v32 = vld [vmem:[%s1786_s6 + $0x38] sm:$0xff]  ;;  %v717_v33 = vld [vmem:[%s1786_s6 + $0x30] sm:$0xff] }
  0x17   : > { %408 = vperm.xlu1 %1431, %v1304_v5   ;;  %368 = vperm.xlu0 %1430, %v350_v6   ;;  %v722_v34 = vld [vmem:[%s1786_s6 + $0x58] sm:$0xff]  ;;  %v721_v35 = vld [vmem:[%s1786_s6 + $0x50] sm:$0xff]  ;;  %v720_v36 = vld [vmem:[%s1786_s6 + $0x48] sm:$0xff] }
  0x18   : > { %v725_v37 = vld [vmem:[%s1786_s6 + $0x70] sm:$0xff]  ;;  %v724_v38 = vld [vmem:[%s1786_s6 + $0x68] sm:$0xff]  ;;  %v723_v39 = vld [vmem:[%s1786_s6 + $0x60] sm:$0xff] }
  0x19   : > { %v726_v40 = vld [vmem:[%s1786_s6 + $0x78] sm:$0xff]  ;;  %v346_v47 = vld [vmem:[%s331_s12] sm:$0x77] }
  0x1a   : > { %v411_v48 = vperm.slane %v346_v47, 1  ;;  %v412_v49 = vperm.slane %v346_v47, 5  ;;  %v372_v50 = vperm.slane %v346_v47, 0  ;;  %v373_v51 = vperm.slane %v346_v47, 4 }
  0x1b   : > { %v458_v54 = vperm.slane %v346_v47, 2  ;;  %v459_v55 = vperm.slane %v346_v47, 6 }
  0x1c   : > { %v415_v57 = vperm.slane %v411_v48, 1  ;;  %v416_v58 = vperm.slane %v412_v49, 1  ;;  %v376_v59 = vperm.slane %v372_v50, 0  ;;  %v377_v60 = vperm.slane %v373_v51, 0 }
  0x1d   : > { %v462_v61 = vperm.slane %v458_v54, 2  ;;  %v463_v62 = vperm.slane %v459_v55, 2 }
  0x1e   : > { %393 = vperm.xlu2 %1432, %v1301_v7  }
  0x1f   : > { %358 = vperm.xlu1 %1431, %v348_v8   ;;  %353 = vperm.xlu0 %1430, %v347_v9  }
  0x26   : > { %445 = vperm.xlu2 %1432, %v1306_v10  }
  0x27   : > { %440 = vperm.xlu1 %1431, %v1305_v11   ;;  %398 = vperm.xlu0 %1430, %v1302_v12  }
  0x2e   : > { %486 = vperm.xlu2 %1432, %v480_v13  }
  0x2f   : > { %501 = vperm.xlu1 %1431, %v483_v14   ;;  %496 = vperm.xlu0 %1430, %v482_v15  }
  0x36   : > { %577 = vperm.xlu2 %1432, %v539_v16  }
  0x37   : > { %572 = vperm.xlu1 %1431, %v538_v17   ;;  %491 = vperm.xlu0 %1430, %v481_v18  }
  0x3e   : > { %552 = vperm.xlu2 %1432, %v534_v19  }
  0x3f   : > { %567 = vperm.xlu1 %1431, %v537_v20   ;;  %562 = vperm.xlu0 %1430, %v536_v21  }
  0x46   : > { %547 = vperm.xlu2 %1432, %v533_v22  }
  0x47   : > { %542 = vperm.xlu1 %1431, %v532_v23   ;;  %557 = vperm.xlu0 %1430, %v535_v24  }
  0x4e   : > { %739 = vperm.xlu2 %1432, %v713_v25  }
  0x4f   : > { %734 = vperm.xlu1 %1431, %v712_v26   ;;  %729 = vperm.xlu0 %1430, %v711_v27  }
  0x56   : > { %754 = vperm.xlu2 %1432, %v716_v28  }
  0x57   : > { %749 = vperm.xlu1 %1431, %v715_v29   ;;  %744 = vperm.xlu0 %1430, %v714_v30  }
  0x5e   : > { %769 = vperm.xlu2 %1432, %v719_v31  }
  0x5f   : > { %764 = vperm.xlu1 %1431, %v718_v32   ;;  %759 = vperm.xlu0 %1430, %v717_v33  }
  0x66   : > { %784 = vperm.xlu2 %1432, %v722_v34  }
  0x67   : > { %779 = vperm.xlu1 %1431, %v721_v35   ;;  %774 = vperm.xlu0 %1430, %v720_v36  }
  0x68   : > { %v451_v41 = vpop.permute.xlu2 %450 }
  0x69   : > { %v468_v9 = vmul.f32 %v462_v61, %v451_v41  ;;  %v469_v10 = vmul.f32 %v463_v62, %v451_v41 }
  0x6e   : > { %799 = vperm.xlu2 %1432, %v725_v37  }
  0x6f   : > { %794 = vperm.xlu1 %1431, %v724_v38   ;;  %789 = vperm.xlu0 %1430, %v723_v39  }
  0x70   : > { %v456_v44 = vpop.permute.xlu2 %455 }
  0x71   : > { %v470_v18 = vmul.f32 %v462_v61, %v456_v44  ;;  %v471_v19 = vmul.f32 %v463_v62, %v456_v44 }
  0x77   : > { %804 = vperm.xlu0 %1430, %v726_v40  }
  0x78   : > { %v394_v56 = vpop.permute.xlu2 %393 }
  0x79   : > { %v417_v20 = vmul.f32 %v415_v57, %v394_v56  ;;  %v418_v21 = vmul.f32 %v416_v58, %v394_v56 }
  0x80   : > { %v446_v15 = vpop.permute.xlu2 %445 }
  0x81   : > { %v404_v42 = vpop.permute.xlu1 %403  ;;  %v364_v43 = vpop.permute.xlu0 %363  ;;  %v466_v48 = vmul.f32 %v462_v61, %v446_v15  ;;  %v467_v49 = vmul.f32 %v463_v62, %v446_v15 }
  0x82   : > { %v421_v63 = vmul.f32 %v415_v57, %v404_v42  ;;  %v422_v0 = vmul.f32 %v416_v58, %v404_v42  ;;  %v382_v1 = vmul.f32 %v376_v59, %v364_v43  ;;  %v383_v2 = vmul.f32 %v377_v60, %v364_v43 }
  0x84   : > { %v429_v11 = vadd.f32 %v421_v63, %v382_v1  ;;  %v430_v12 = vadd.f32 %v422_v0, %v383_v2 }
  0x86   : > { %v476_v28 = vadd.f32 %v468_v9, %v429_v11  ;;  %v477_v29 = vadd.f32 %v469_v10, %v430_v12 }
  0x89   : > { %v409_v45 = vpop.permute.xlu1 %408  ;;  %v369_v46 = vpop.permute.xlu0 %368 }
  0x8a   : > { %v423_v3 = vmul.f32 %v415_v57, %v409_v45  ;;  %v424_v4 = vmul.f32 %v416_v58, %v409_v45  ;;  %v384_v5 = vmul.f32 %v376_v59, %v369_v46  ;;  %v385_v6 = vmul.f32 %v377_v60, %v369_v46 }
  0x8c   : > { %v431_v13 = vadd.f32 %v423_v3, %v384_v5  ;;  %v432_v14 = vadd.f32 %v424_v4, %v385_v6  ;;  %v1387_v4 = vld [vmem:[%s1783_s3 + $0x10] sm:$0xff]  ;;  %v1388_v5 = vld [vmem:[%s1783_s3 + $0x18] sm:$0xff] }
  0x8e   : > { %v478_v26 = vadd.f32 %v470_v18, %v431_v13  ;;  %v479_v27 = vadd.f32 %v471_v19, %v432_v14 }
  0x91   : > { %v359_v52 = vpop.permute.xlu1 %358  ;;  %v354_v53 = vpop.permute.xlu0 %353 }
  0x92   : > { %v378_v16 = vmul.f32 %v376_v59, %v354_v53  ;;  %v379_v17 = vmul.f32 %v377_v60, %v354_v53  ;;  %v380_v30 = vmul.f32 %v376_v59, %v359_v52  ;;  %v381_v31 = vmul.f32 %v377_v60, %v359_v52  ;;  %v487_v52 = vpop.permute.xlu2 %486 }
  0x94   : > { %v425_v32 = vadd.f32 %v417_v20, %v378_v16  ;;  %v426_v33 = vadd.f32 %v418_v21, %v379_v17 }
  0x99   : > { %v441_v7 = vpop.permute.xlu1 %440  ;;  %v399_v8 = vpop.permute.xlu0 %398 }
  0x9a   : > { %v464_v22 = vmul.f32 %v462_v61, %v441_v7  ;;  %v465_v23 = vmul.f32 %v463_v62, %v441_v7  ;;  %v419_v24 = vmul.f32 %v415_v57, %v399_v8  ;;  %v420_v25 = vmul.f32 %v416_v58, %v399_v8  ;;  %v1385_v61 = vld [vmem:[%s1783_s3] sm:$0xff]  ;;  %v1386_v62 = vld [vmem:[%s1783_s3 + $0x8] sm:$0xff]  ;;  %v578_v18 = vpop.permute.xlu2 %577 }
  0x9c   : > { %v472_v40 = vadd.f32 %v464_v22, %v425_v32  ;;  %v473_v41 = vadd.f32 %v465_v23, %v426_v33  ;;  %v427_v42 = vadd.f32 %v419_v24, %v380_v30  ;;  %v428_v43 = vadd.f32 %v420_v25, %v381_v31 }
  0x9e   : > { %v474_v53 = vadd.f32 %v466_v48, %v427_v42  ;;  %v475_v54 = vadd.f32 %v467_v49, %v428_v43  ;;  %v504_v55 = vadd.f32 %v487_v52, %v472_v40  ;;  %v505_v56 = vadd.f32 %v487_v52, %v473_v41 }
  0xa0   : > { %v512_v0 = vmax.f32 %v504_v55, 0.0  ;;  %v513_v1 = vmax.f32 %v505_v56, 0.0 }
  0xa1   : > { %v502_v34 = vpop.permute.xlu1 %501  ;;  %v497_v35 = vpop.permute.xlu0 %496 }
  0xa2   : > { %v510_v36 = vadd.f32 %v502_v34, %v478_v26  ;;  %v511_v37 = vadd.f32 %v502_v34, %v479_v27  ;;  %v508_v38 = vadd.f32 %v497_v35, %v476_v28  ;;  %v509_v39 = vadd.f32 %v497_v35, %v477_v29  ;;  %v553_v23 = vpop.permute.xlu2 %552 }
  0xa4   : > { %v516_v44 = vmax.f32 %v508_v38, 0.0  ;;  %v518_v45 = vmax.f32 %v510_v36, 0.0  ;;  %v517_v46 = vmax.f32 %v509_v39, 0.0  ;;  %v519_v47 = vmax.f32 %v511_v37, 0.0 }
  0xa6   : > { %v530_v50 = vpack.c.bf16 %v518_v45, %v516_v44  ;;  %v531_v51 = vpack.c.bf16 %v519_v47, %v517_v46 }
  0xa8   : > { %619 = vmatpush.bf16.msra.mxu0 %v530_v50  ;;  %648 = vmatpush.bf16.msra.mxu1 %v531_v51 }
  0xa9   : > { %v492_v57 = vpop.permute.xlu0 %491  ;;  %v573_v19 = vpop.permute.xlu1 %572 }
  0xaa   : > { %v506_v58 = vadd.f32 %v492_v57, %v474_v53  ;;  %v507_v59 = vadd.f32 %v492_v57, %v475_v54  ;;  %v548_v48 = vpop.permute.xlu2 %547 }
  0xac   : > { %v514_v60 = vmax.f32 %v506_v58, 0.0  ;;  %v515_v63 = vmax.f32 %v507_v59, 0.0 }
  0xae   : > { %v528_v2 = vpack.c.bf16 %v514_v60, %v512_v0  ;;  %v529_v3 = vpack.c.bf16 %v515_v63, %v513_v1 }
  0xb0   : > { %620 = vmatpush.bf16.msra.mxu0 %v528_v2  ;;  %649 = vmatpush.bf16.msra.mxu1 %v529_v3 }
  0xb1   : > { %v563_v22 = vpop.permute.xlu0 %562  ;;  %v568_v24 = vpop.permute.xlu1 %567 }
  0xb3   : > { %1325 = vmatmul.msk.bf16.vlgmr.msra.gmra.mxu0 %vm600_vm0, %v1385_v61  ;;  %1329 = vmatmul.msk.bf16.vlgmr.msra.gmra.mxu1 %vm600_vm0, %v1385_v61 }
  0xb9   : > { %v558_v38 = vpop.permute.xlu0 %557  ;;  %v543_v54 = vpop.permute.xlu1 %542 }
  0xc3   : > { %1326 = vmatmul.msk.bf16.gmra.mxu0 %vm600_vm0, %v1386_v62  ;;  %1330 = vmatmul.msk.bf16.gmra.mxu1 %vm600_vm0, %v1386_v62 }
  0xd3   : > { %1327 = vmatmul.msk.bf16.gmra.mxu0 %vm600_vm0, %v1387_v4  ;;  %1331 = vmatmul.msk.bf16.gmra.mxu1 %vm600_vm0, %v1387_v4 }
  0xe3   : > { %1328 = vmatmul.msk.bf16.gmra.mxu0 %vm600_vm0, %v1388_v5  ;;  %1332 = vmatmul.msk.bf16.gmra.mxu1 %vm600_vm0, %v1388_v5 }
 0x130   : > { %v622_v6 = vpop.f32.mrf.mxu0  ;;  %v651_v7 = vpop.f32.mrf.mxu1 }
 0x131   : > { %v623_v58 = vadd.f32 %v622_v6, %v543_v54  ;;  %v652_v60 = vadd.f32 %v651_v7, %v543_v54  ;;  %v1389_v6 = vld [vmem:[%s1785_s5] sm:$0xff]  ;;  %v1391_v7 = vld [vmem:[%s1785_s5 + $0x10] sm:$0xff] }
 0x133   : > { %v671_v61 = vmax.f32 %v623_v58, 0.0  ;;  %v672_v62 = vmax.f32 %v652_v60, 0.0 }
 0x138   : > { %v624_v8 = vpop.f32.mrf.mxu0  ;;  %v653_v9 = vpop.f32.mrf.mxu1 }
 0x139   : > { %v625_v51 = vadd.f32 %v624_v8, %v548_v48  ;;  %v654_v55 = vadd.f32 %v653_v9, %v548_v48  ;;  %v1390_v8 = vld [vmem:[%s1785_s5 + $0x8] sm:$0xff]  ;;  %v1392_v9 = vld [vmem:[%s1785_s5 + $0x18] sm:$0xff] }
 0x13b   : > { %v673_v0 = vmax.f32 %v625_v51, 0.0  ;;  %v674_v2 = vmax.f32 %v654_v55, 0.0 }
 0x13d   : > { %v703_v4 = vpack.c.bf16 %v673_v0, %v671_v61  ;;  %v704_v5 = vpack.c.bf16 %v674_v2, %v672_v62 }
 0x140   : > { %v627_v10 = vpop.f32.mrf.mxu0  ;;  %v656_v11 = vpop.f32.mrf.mxu1 }
 0x141   : > { %v628_v46 = vadd.f32 %v627_v10, %v553_v23  ;;  %v657_v49 = vadd.f32 %v656_v11, %v553_v23  ;;  %v1393_v10 = vld [vmem:[%s1785_s5 + $0x20] sm:$0xff]  ;;  %v1394_v11 = vld [vmem:[%s1785_s5 + $0x28] sm:$0xff] }
 0x143   : > { %v675_v59 = vmax.f32 %v628_v46, 0.0  ;;  %v676_v63 = vmax.f32 %v657_v49, 0.0 }
 0x148   : > { %v629_v12 = vpop.f32.mrf.mxu0  ;;  %v658_v13 = vpop.f32.mrf.mxu1 }
 0x149   : > { %v630_v40 = vadd.f32 %v629_v12, %v558_v38  ;;  %v659_v44 = vadd.f32 %v658_v13, %v558_v38  ;;  %v1395_v12 = vld [vmem:[%s1785_s5 + $0x30] sm:$0xff]  ;;  %v1396_v13 = vld [vmem:[%s1785_s5 + $0x38] sm:$0xff] }
 0x14b   : > { %v677_v52 = vmax.f32 %v630_v40, 0.0  ;;  %v678_v56 = vmax.f32 %v659_v44, 0.0 }
 0x14d   : > { %v705_v1 = vpack.c.bf16 %v677_v52, %v675_v59  ;;  %v706_v3 = vpack.c.bf16 %v678_v56, %v676_v63 }
 0x150   : > { %v632_v14 = vpop.f32.mrf.mxu0  ;;  %v661_v15 = vpop.f32.mrf.mxu1 }
 0x151   : > { %v633_v32 = vadd.f32 %v632_v14, %v563_v22  ;;  %v662_v39 = vadd.f32 %v661_v15, %v563_v22  ;;  %v1003_v14 = vlaneseq }
 0x153   : > { %v679_v47 = vmax.f32 %v633_v32, 0.0  ;;  %v680_v50 = vmax.f32 %v662_v39, 0.0  ;;  %v1004_v15 = vand.u32 127, %v1003_v14 }
 0x158   : > { %v634_v16 = vpop.f32.mrf.mxu0  ;;  %v663_v17 = vpop.f32.mrf.mxu1 }
 0x159   : > { %v635_v29 = vadd.f32 %v634_v16, %v568_v24  ;;  %v664_v33 = vadd.f32 %v663_v17, %v568_v24  ;;  %v735_v16 = vpop.permute.xlu1 %734  ;;  %v1698_v17 = vadd.s32 128, %v1004_v15  ;;  %v740_v24 = vpop.permute.xlu2 %739 }
 0x15b   : > { %v681_v41 = vmax.f32 %v635_v29, 0.0  ;;  %v682_v45 = vmax.f32 %v664_v33, 0.0  ;;  %vm1011_vm2 = vcmp.lt.s32.totalorder %v1698_v17, 200 }
 0x15d   : > { %v707_v53 = vpack.c.bf16 %v681_v41, %v679_v47  ;;  %v708_v57 = vpack.c.bf16 %v682_v45, %v680_v50 }
 0x160   : > { %v637_v20 = vpop.f32.mrf.mxu0  ;;  %v666_v21 = vpop.f32.mrf.mxu1 }
 0x161   : > { %v638_v25 = vadd.f32 %v637_v20, %v573_v19  ;;  %v667_v26 = vadd.f32 %v666_v21, %v573_v19  ;;  %v755_v45 = vpop.permute.xlu2 %754 }
 0x163   : > { %v683_v34 = vmax.f32 %v638_v25, 0.0  ;;  %v684_v35 = vmax.f32 %v667_v26, 0.0  ;;  %v750_v26 = vpop.permute.xlu1 %749 }
 0x168   : > { %v639_v27 = vpop.f32.mrf.mxu0  ;;  %v668_v28 = vpop.f32.mrf.mxu1 }
 0x169   : > { %v640_v30 = vadd.f32 %v639_v27, %v578_v18  ;;  %v669_v31 = vadd.f32 %v668_v28, %v578_v18  ;;  %v730_v18 = vpop.permute.xlu0 %729 }
 0x16b   : > { %v685_v36 = vmax.f32 %v640_v30, 0.0  ;;  %v686_v37 = vmax.f32 %v669_v31, 0.0 }
 0x16d   : > { %v709_v42 = vpack.c.bf16 %v685_v36, %v683_v34  ;;  %v710_v43 = vpack.c.bf16 %v686_v37, %v684_v35 }
 0x16f   : > { %876 = vmatpush.bf16.msrb.mxu0 %v709_v42  ;;  %1397 = vmatpush.bf16.msra.mxu2 %v709_v42 }
 0x170   : > { %925 = vmatpush.bf16.msrb.mxu1 %v710_v43  ;;  %1401 = vmatpush.bf16.msra.mxu3 %v710_v43 }
 0x171   : > { %v745_v41 = vpop.permute.xlu0 %744 }
 0x173   : > { %877 = vmatpush.bf16.msrb.mxu0 %v707_v53  ;;  %1398 = vmatpush.bf16.msra.mxu2 %v707_v53 }
 0x174   : > { %926 = vmatpush.bf16.msrb.mxu1 %v708_v57  ;;  %1402 = vmatpush.bf16.msra.mxu3 %v708_v57 }
 0x177   : > { %878 = vmatpush.bf16.msrb.mxu0 %v705_v1  ;;  %1399 = vmatpush.bf16.msra.mxu2 %v705_v1 }
 0x178   : > { %927 = vmatpush.bf16.msrb.mxu1 %v706_v3  ;;  %1403 = vmatpush.bf16.msra.mxu3 %v706_v3 }
 0x179   : > { %v760_v2 = vpop.permute.xlu0 %759 }
 0x17b   : > { %879 = vmatpush.bf16.msrb.mxu0 %v703_v4  ;;  %1400 = vmatpush.bf16.msra.mxu2 %v703_v4 }
 0x17c   : > { %928 = vmatpush.bf16.msrb.mxu1 %v704_v5  ;;  %1404 = vmatpush.bf16.msra.mxu3 %v704_v5 }
 0x17e   : > { %1365 = vmatmul.msk.bf16.vlgmr.msrb.gmra.mxu0 %vm847_vm1, %v1389_v6  ;;  %1367 = vmatmul.msk.bf16.vlgmr.msra.gmra.mxu2 %vm847_vm1, %v1391_v7 }
 0x17f   : > { %1373 = vmatmul.msk.bf16.vlgmr.msrb.gmra.mxu1 %vm847_vm1, %v1389_v6  ;;  %1375 = vmatmul.msk.bf16.vlgmr.msra.gmra.mxu3 %vm847_vm1, %v1391_v7 }
 0x18e   : > { %1366 = vmatmul.msk.bf16.gmra.mxu0 %vm847_vm1, %v1390_v8  ;;  %1368 = vmatmul.msk.bf16.gmra.mxu2 %vm847_vm1, %v1392_v9 }
 0x18f   : > { %1374 = vmatmul.msk.bf16.gmra.mxu1 %vm847_vm1, %v1390_v8  ;;  %1376 = vmatmul.msk.bf16.gmra.mxu3 %vm847_vm1, %v1392_v9 }
 0x19e   : > { %1369 = vmatmul.msk.bf16.gmra.mxu2 %vm847_vm1, %v1393_v10 }
 0x19f   : > { %1377 = vmatmul.msk.bf16.gmra.mxu3 %vm847_vm1, %v1393_v10 }
 0x1ae   : > { %1370 = vmatmul.msk.bf16.gmra.mxu2 %vm847_vm1, %v1394_v11 }
 0x1af   : > { %1378 = vmatmul.msk.bf16.gmra.mxu3 %vm847_vm1, %v1394_v11 }
 0x1be   : > { %1371 = vmatmul.msk.bf16.gmra.mxu2 %vm847_vm1, %v1395_v12 }
 0x1bf   : > { %1379 = vmatmul.msk.bf16.gmra.mxu3 %vm847_vm1, %v1395_v12 }
 0x1ce   : > { %1372 = vmatmul.msk.bf16.gmra.mxu2 %vm847_vm1, %v1396_v13 }
 0x1cf   : > { %1380 = vmatmul.msk.bf16.gmra.mxu3 %vm847_vm1, %v1396_v13 }
 0x1fb   : > { %v881_v19 = vpop.f32.mrf.mxu0 }
 0x1fc   : > { %v882_v20 = vadd.f32 %v881_v19, %v730_v18  ;;  %v930_v21 = vpop.f32.mrf.mxu1 }
 0x1fd   : > { %v931_v22 = vadd.f32 %v930_v21, %v730_v18 }
 0x1fe   : > { %v970_v23 = vmax.f32 %v882_v20, 0.0  ;;  %v765_v20 = vpop.permute.xlu1 %764 }
 0x1ff   : > { %v971_v25 = vmax.f32 %v931_v22, 0.0 }
 0x201   : > { %v891_v27 = vpop.f32.mrf.mxu2  ;;  %v1017_v28 = vsel %vm1011_vm2, %v971_v25, 0.0 }
 0x202   : > { %v892_v29 = vadd.f32 %v891_v27, %v750_v26  ;;  %v940_v30 = vpop.f32.mrf.mxu3  ;;  %v1048_v31 = vmax.f32 %v970_v23, %v1017_v28 }
 0x203   : > { %v941_v32 = vadd.f32 %v940_v30, %v750_v26  ;;  %v883_v33 = vpop.f32.mrf.mxu0 }
 0x204   : > { %v978_v34 = vmax.f32 %v892_v29, 0.0  ;;  %v884_v35 = vadd.f32 %v883_v33, %v735_v16  ;;  %v932_v36 = vpop.f32.mrf.mxu1  ;;  %v1100_v37 = vmax.f32 %v1048_v31, 0.0  ;;  %v770_v33 = vpop.permute.xlu2 %769 }
 0x205   : > { %v979_v38 = vmax.f32 %v941_v32, 0.0  ;;  %v933_v39 = vadd.f32 %v932_v36, %v735_v16 }
 0x206   : > { %v972_v40 = vmax.f32 %v884_v35, 0.0  ;;  %1151 = vmax.xlane.f32.xlu1 %v1100_v37 }
 0x207   : > { %v973_v42 = vmax.f32 %v933_v39, 0.0  ;;  %v1025_v43 = vsel %vm1011_vm2, %v979_v38, 0.0 }
 0x208   : > { %v1052_v44 = vmax.f32 %v978_v34, %v1025_v43  ;;  %v775_v43 = vpop.permute.xlu0 %774 }
 0x209   : > { %v893_v46 = vpop.f32.mrf.mxu2  ;;  %v1019_v47 = vsel %vm1011_vm2, %v973_v42, 0.0 }
 0x20a   : > { %v894_v48 = vadd.f32 %v893_v46, %v755_v45  ;;  %v942_v49 = vpop.f32.mrf.mxu3  ;;  %v1049_v50 = vmax.f32 %v972_v40, %v1019_v47  ;;  %v1104_v57 = vmax.f32 %v1052_v44, 0.0 }
 0x20b   : > { %v943_v51 = vadd.f32 %v942_v49, %v755_v45  ;;  %v886_v52 = vpop.f32.mrf.mxu0 }
 0x20c   : > { %v980_v53 = vmax.f32 %v894_v48, 0.0  ;;  %v887_v54 = vadd.f32 %v886_v52, %v740_v24  ;;  %v935_v55 = vpop.f32.mrf.mxu1  ;;  %v1101_v56 = vmax.f32 %v1049_v50, 0.0 }
 0x20d   : > { %v981_v58 = vmax.f32 %v943_v51, 0.0  ;;  %v936_v59 = vadd.f32 %v935_v55, %v740_v24 }
 0x20e   : > { %v974_v60 = vmax.f32 %v887_v54, 0.0  ;;  %1153 = vmax.xlane.f32.xlu2 %v1101_v56  ;;  %1159 = vmax.xlane.f32.xlu1 %v1104_v57 }
 0x20f   : > { %v975_v63 = vmax.f32 %v936_v59, 0.0  ;;  %v1027_v0 = vsel %vm1011_vm2, %v981_v58, 0.0 }
 0x210   : > { %v1053_v1 = vmax.f32 %v980_v53, %v1027_v0  ;;  %v780_v53 = vpop.permute.xlu1 %779 }
 0x211   : > { %v896_v3 = vpop.f32.mrf.mxu2  ;;  %v1021_v61 = vsel %vm1011_vm2, %v975_v63, 0.0 }
 0x212   : > { %v897_v62 = vadd.f32 %v896_v3, %v760_v2  ;;  %v945_v4 = vpop.f32.mrf.mxu3  ;;  %v1050_v5 = vmax.f32 %v974_v60, %v1021_v61  ;;  %v1105_v12 = vmax.f32 %v1053_v1, 0.0  ;;  %v785_v1 = vpop.permute.xlu2 %784 }
 0x213   : > { %v946_v6 = vadd.f32 %v945_v4, %v760_v2  ;;  %v888_v7 = vpop.f32.mrf.mxu0 }
 0x214   : > { %v982_v8 = vmax.f32 %v897_v62, 0.0  ;;  %v889_v9 = vadd.f32 %v888_v7, %v745_v41  ;;  %v937_v10 = vpop.f32.mrf.mxu1  ;;  %v1102_v11 = vmax.f32 %v1050_v5, 0.0 }
 0x215   : > { %v983_v13 = vmax.f32 %v946_v6, 0.0  ;;  %v938_v14 = vadd.f32 %v937_v10, %v745_v41 }
 0x216   : > { %v976_v15 = vmax.f32 %v889_v9, 0.0  ;;  %1155 = vmax.xlane.f32.xlu0 %v1102_v11  ;;  %1161 = vmax.xlane.f32.xlu2 %v1105_v12  ;;  %v790_v9 = vpop.permute.xlu0 %789 }
 0x217   : > { %v977_v16 = vmax.f32 %v938_v14, 0.0  ;;  %v1029_v18 = vsel %vm1011_vm2, %v983_v13, 0.0 }
 0x218   : > { %v1054_v19 = vmax.f32 %v982_v8, %v1029_v18 }
 0x219   : > { %v898_v21 = vpop.f32.mrf.mxu2  ;;  %v1023_v22 = vsel %vm1011_vm2, %v977_v16, 0.0 }
 0x21a   : > { %v899_v23 = vadd.f32 %v898_v21, %v765_v20  ;;  %v947_v24 = vpop.f32.mrf.mxu3  ;;  %v1051_v25 = vmax.f32 %v976_v15, %v1023_v22  ;;  %v1106_v28 = vmax.f32 %v1054_v19, 0.0 }
 0x21b   : > { %v948_v26 = vadd.f32 %v947_v24, %v765_v20  ;;  %v795_v20 = vpop.permute.xlu1 %794 }
 0x21c   : > { %v984_v27 = vmax.f32 %v899_v23, 0.0  ;;  %v1103_v29 = vmax.f32 %v1051_v25, 0.0 }
 0x21d   : > { %v985_v30 = vmax.f32 %v948_v26, 0.0 }
 0x21e   : > { %1163 = vmax.xlane.f32.xlu0 %v1106_v28  ;;  %1157 = vmax.xlane.f32.xlu2 %v1103_v29 }
 0x21f   : > { %v1031_v31 = vsel %vm1011_vm2, %v985_v30, 0.0  ;;  %v800_v30 = vpop.permute.xlu2 %799 }
 0x220   : > { %v1055_v32 = vmax.f32 %v984_v27, %v1031_v31 }
 0x221   : > { %v901_v34 = vpop.f32.mrf.mxu2 }
 0x222   : > { %v902_v35 = vadd.f32 %v901_v34, %v770_v33  ;;  %v950_v36 = vpop.f32.mrf.mxu3  ;;  %v1107_v37 = vmax.f32 %v1055_v32, 0.0 }
 0x223   : > { %v951_v38 = vadd.f32 %v950_v36, %v770_v33 }
 0x224   : > { %v986_v39 = vmax.f32 %v902_v35, 0.0  ;;  %1165 = vmax.xlane.f32.xlu1 %v1107_v37 }
 0x225   : > { %v987_v40 = vmax.f32 %v951_v38, 0.0 }
 0x227   : > { %v1033_v41 = vsel %vm1011_vm2, %v987_v40, 0.0  ;;  %v805_v40 = vpop.permute.xlu0 %804 }
 0x228   : > { %v1056_v42 = vmax.f32 %v986_v39, %v1033_v41 }
 0x229   : > { %v903_v44 = vpop.f32.mrf.mxu2 }
 0x22a   : > { %v904_v45 = vadd.f32 %v903_v44, %v775_v43  ;;  %v952_v46 = vpop.f32.mrf.mxu3  ;;  %v1108_v47 = vmax.f32 %v1056_v42, 0.0 }
 0x22b   : > { %v953_v48 = vadd.f32 %v952_v46, %v775_v43 }
 0x22c   : > { %v988_v49 = vmax.f32 %v904_v45, 0.0  ;;  %1167 = vmax.xlane.f32.xlu2 %v1108_v47 }
 0x22d   : > { %v989_v50 = vmax.f32 %v953_v48, 0.0 }
 0x22f   : > { %v1035_v51 = vsel %vm1011_vm2, %v989_v50, 0.0 }
 0x230   : > { %v1057_v52 = vmax.f32 %v988_v49, %v1035_v51 }
 0x231   : > { %v906_v54 = vpop.f32.mrf.mxu2 }
 0x232   : > { %v907_v55 = vadd.f32 %v906_v54, %v780_v53  ;;  %v955_v56 = vpop.f32.mrf.mxu3  ;;  %v1109_v57 = vmax.f32 %v1057_v52, 0.0 }
 0x233   : > { %v956_v58 = vadd.f32 %v955_v56, %v780_v53 }
 0x234   : > { %v990_v59 = vmax.f32 %v907_v55, 0.0  ;;  %1169 = vmax.xlane.f32.xlu0 %v1109_v57 }
 0x235   : > { %v991_v60 = vmax.f32 %v956_v58, 0.0 }
 0x237   : > { %v1037_v63 = vsel %vm1011_vm2, %v991_v60, 0.0 }
 0x238   : > { %v1058_v0 = vmax.f32 %v990_v59, %v1037_v63 }
 0x239   : > { %v908_v2 = vpop.f32.mrf.mxu2 }
 0x23a   : > { %v909_v3 = vadd.f32 %v908_v2, %v785_v1  ;;  %v957_v61 = vpop.f32.mrf.mxu3  ;;  %v1110_v62 = vmax.f32 %v1058_v0, 0.0 }
 0x23b   : > { %v958_v4 = vadd.f32 %v957_v61, %v785_v1 }
 0x23c   : > { %v992_v5 = vmax.f32 %v909_v3, 0.0  ;;  %1171 = vmax.xlane.f32.xlu1 %v1110_v62 }
 0x23d   : > { %v993_v6 = vmax.f32 %v958_v4, 0.0 }
 0x23f   : > { %v1039_v7 = vsel %vm1011_vm2, %v993_v6, 0.0 }
 0x240   : > { %v1059_v8 = vmax.f32 %v992_v5, %v1039_v7 }
 0x241   : > { %v911_v10 = vpop.f32.mrf.mxu2 }
 0x242   : > { %v912_v11 = vadd.f32 %v911_v10, %v790_v9  ;;  %v960_v12 = vpop.f32.mrf.mxu3  ;;  %v1111_v13 = vmax.f32 %v1059_v8, 0.0 }
 0x243   : > { %v961_v14 = vadd.f32 %v960_v12, %v790_v9 }
 0x244   : > { %v994_v15 = vmax.f32 %v912_v11, 0.0  ;;  %1173 = vmax.xlane.f32.xlu2 %v1111_v13 }
 0x245   : > { %v995_v16 = vmax.f32 %v961_v14, 0.0 }
 0x247   : > { %v1041_v18 = vsel %vm1011_vm2, %v995_v16, 0.0 }
 0x248   : > { %v1060_v19 = vmax.f32 %v994_v15, %v1041_v18 }
 0x249   : > { %v913_v21 = vpop.f32.mrf.mxu2 }
 0x24a   : > { %v914_v22 = vadd.f32 %v913_v21, %v795_v20  ;;  %v962_v23 = vpop.f32.mrf.mxu3  ;;  %v1112_v24 = vmax.f32 %v1060_v19, 0.0 }
 0x24b   : > { %v963_v25 = vadd.f32 %v962_v23, %v795_v20 }
 0x24c   : > { %v996_v26 = vmax.f32 %v914_v22, 0.0  ;;  %1175 = vmax.xlane.f32.xlu0 %v1112_v24 }
 0x24d   : > { %v997_v27 = vmax.f32 %v963_v25, 0.0 }
 0x24f   : > { %v1043_v28 = vsel %vm1011_vm2, %v997_v27, 0.0 }
 0x250   : > { %v1061_v29 = vmax.f32 %v996_v26, %v1043_v28 }
 0x251   : > { %v916_v31 = vpop.f32.mrf.mxu2 }
 0x252   : > { %v917_v32 = vadd.f32 %v916_v31, %v800_v30  ;;  %v965_v33 = vpop.f32.mrf.mxu3  ;;  %v1113_v34 = vmax.f32 %v1061_v29, 0.0 }
 0x253   : > { %v966_v35 = vadd.f32 %v965_v33, %v800_v30 }
 0x254   : > { %v998_v36 = vmax.f32 %v917_v32, 0.0  ;;  %1177 = vmax.xlane.f32.xlu1 %v1113_v34 }
 0x255   : > { %v999_v37 = vmax.f32 %v966_v35, 0.0 }
 0x257   : > { %v1045_v38 = vsel %vm1011_vm2, %v999_v37, 0.0 }
 0x258   : > { %v1062_v39 = vmax.f32 %v998_v36, %v1045_v38 }
 0x259   : > { %v918_v41 = vpop.f32.mrf.mxu2 }
 0x25a   : > { %v919_v42 = vadd.f32 %v918_v41, %v805_v40  ;;  %v967_v43 = vpop.f32.mrf.mxu3  ;;  %v1114_v44 = vmax.f32 %v1062_v39, 0.0 }
 0x25b   : > { %v968_v45 = vadd.f32 %v967_v43, %v805_v40 }
 0x25c   : > { %v1000_v46 = vmax.f32 %v919_v42, 0.0  ;;  %1179 = vmax.xlane.f32.xlu2 %v1114_v44 }
 0x25d   : > { %v1001_v47 = vmax.f32 %v968_v45, 0.0 }
 0x25f   : > { %v1047_v48 = vsel %vm1011_vm2, %v1001_v47, 0.0 }
 0x260   : > { %v1063_v49 = vmax.f32 %v1000_v46, %v1047_v48 }
 0x262   : > { %v1115_v50 = vmax.f32 %v1063_v49, 0.0 }
 0x264   : > { %1181 = vmax.xlane.f32.xlu0 %v1115_v50 }
 0x279   : > { %v1152_v17 = vpop.xlane.xlu1 %1151 }
 0x27a   : > { %1184 = vst.msk [vmem:[%s1737_s21] sm:$0xff] %vm1183_vm3, %v1152_v17 }
 0x281   : > { %v1154_v51 = vpop.xlane.xlu2 %1153  ;;  %v1160_v52 = vpop.xlane.xlu1 %1159 }
 0x282   : > { %1185 = vst.msk [vmem:[%s1737_s21 + $0x8] sm:$0xff] %vm1183_vm3, %v1154_v51 }
 0x283   : > { %1188 = vst.msk [vmem:[%s1737_s21 + $0x20] sm:$0xff] %vm1183_vm3, %v1160_v52 }
 0x289   : > { %v1156_v53 = vpop.xlane.xlu0 %1155  ;;  %v1162_v54 = vpop.xlane.xlu2 %1161 }
 0x28a   : > { %1186 = vst.msk [vmem:[%s1737_s21 + $0x10] sm:$0xff] %vm1183_vm3, %v1156_v53 }
 0x28b   : > { %1189 = vst.msk [vmem:[%s1737_s21 + $0x28] sm:$0xff] %vm1183_vm3, %v1162_v54 }
 0x291   : > { %v1164_v55 = vpop.xlane.xlu0 %1163  ;;  %v1158_v56 = vpop.xlane.xlu2 %1157 }
 0x292   : > { %1190 = vst.msk [vmem:[%s1737_s21 + $0x30] sm:$0xff] %vm1183_vm3, %v1164_v55 }
 0x293   : > { %1187 = vst.msk [vmem:[%s1737_s21 + $0x18] sm:$0xff] %vm1183_vm3, %v1158_v56 }
 0x297   : > { %v1166_v57 = vpop.xlane.xlu1 %1165 }
 0x298   : > { %1191 = vst.msk [vmem:[%s1737_s21 + $0x38] sm:$0xff] %vm1183_vm3, %v1166_v57 }
 0x29f   : > { %v1168_v58 = vpop.xlane.xlu2 %1167 }
 0x2a0   : > { %1192 = vst.msk [vmem:[%s1737_s21 + $0x40] sm:$0xff] %vm1183_vm3, %v1168_v58 }
 0x2a7   : > { %v1170_v59 = vpop.xlane.xlu0 %1169 }
 0x2a8   : > { %1193 = vst.msk [vmem:[%s1737_s21 + $0x48] sm:$0xff] %vm1183_vm3, %v1170_v59 }
 0x2af   : > { %v1172_v60 = vpop.xlane.xlu1 %1171 }
 0x2b0   : > { %1194 = vst.msk [vmem:[%s1737_s21 + $0x50] sm:$0xff] %vm1183_vm3, %v1172_v60 }
 0x2b7   : > { %v1174_v63 = vpop.xlane.xlu2 %1173 }
 0x2b8   : > { %1195 = vst.msk [vmem:[%s1737_s21 + $0x58] sm:$0xff] %vm1183_vm3, %v1174_v63 }
 0x2bf   : > { %v1176_v0 = vpop.xlane.xlu0 %1175 }
 0x2c0   : > { %1196 = vst.msk [vmem:[%s1737_s21 + $0x60] sm:$0xff] %vm1183_vm3, %v1176_v0 }
 0x2c7   : > { %v1178_v1 = vpop.xlane.xlu1 %1177 }
 0x2c8   : > { %1197 = vst.msk [vmem:[%s1737_s21 + $0x68] sm:$0xff] %vm1183_vm3, %v1178_v1 }
 0x2cf   : > { %v1180_v2 = vpop.xlane.xlu2 %1179 }
 0x2d0   : > { %1198 = vst.msk [vmem:[%s1737_s21 + $0x70] sm:$0xff] %vm1183_vm3, %v1180_v2 }
 0x2d7   : > { %v1182_v3 = vpop.xlane.xlu0 %1181 }
 0x2d8   : > { %1199 = vst.msk [vmem:[%s1737_s21 + $0x78] sm:$0xff] %vm1183_vm3, %v1182_v3 }
 0x2d9 PF: > { %s17_s26 = sadd.s32 1, %s1455_s26   ;;  %s1788_s24 = smov %s1451_s25 }
 0x2da   : > { %p14_p5 = scmp.ge.s32.totalorder %s17_s26, 4   ;;  %s1789_s25 = smov %s1791_s27 }
 0x2dc   :  { %16 = sbr.rel (!%p14_p5) target bundleno = 2 (0x2), region = 88 }

</bundles_post_ra>
